<compile_context>
chip_gen: v7x
topology: tpu7x:2x2x1
jax: 0.10.0
libtpu: 0.0.40
codegen_flags: <defaults>
</compile_context>

<pallas_src>
import jax
import jax.numpy as jnp
from jax.experimental import pallas as pl
from jax.experimental.pallas import tpu as pltpu


def _round_up(x, m):
    return ((x + m - 1) // m) * m


def _lora_kernel_f32out(x_ref, wt_ref, b_ref, d_ref, ut_ref, o_ref):
    """f32-output variant: accumulate straight into the resident output block."""
    k = pl.program_id(2)

    @pl.when(k == 0)
    def _():
        # Bias + tiny LoRA up-projection, once per (i, j) block.  `scale` is
        # already folded into ut; d is the precomputed (scaled-path) LoRA-down.
        o_ref[...] = b_ref[...] + jnp.dot(
            d_ref[...], ut_ref[...].astype(jnp.float32),
            preferred_element_type=jnp.float32)

    # Main GEMM partial product: x_tile @ (W^T)_tile -> (tm, tn)
    o_ref[...] += jnp.dot(x_ref[...], wt_ref[...],
                          preferred_element_type=jnp.float32)


def _lora_kernel_acc(x_ref, wt_ref, b_ref, d_ref, ut_ref, o_ref, acc_ref):
    """Generic variant (e.g. bf16 output): f32 VMEM accumulator + cast epilogue."""
    k = pl.program_id(2)

    @pl.when(k == 0)
    def _():
        acc_ref[...] = jnp.zeros_like(acc_ref)

    acc_ref[...] += jnp.dot(x_ref[...], wt_ref[...],
                            preferred_element_type=jnp.float32)

    @pl.when(k == pl.num_programs(2) - 1)
    def _():
        up = jnp.dot(d_ref[...], ut_ref[...].astype(jnp.float32),
                     preferred_element_type=jnp.float32)
        o_ref[...] = (acc_ref[...] + b_ref[...] + up).astype(o_ref.dtype)


def prepare_lora_linear(w, b, a, u, *, alpha, rank, tn=512, tk=1024):
    """One-time (per parameter set) weight preparation.

    w: (out, in)  b: (out,)  a: (rank, in)  u: (out, rank)
    Returns a dict of pre-transposed / pre-padded params + tiling metadata.
    """
    out_f, in_f = w.shape
    r = a.shape[0]
    assert u.shape == (out_f, r)
    scale = float(alpha) / float(rank)

    tn = min(tn, _round_up(out_f, 128))
    tk = min(tk, _round_up(in_f, 128))
    N_p = _round_up(out_f, tn)
    K_p = _round_up(in_f, tk)

    # v7x has 2 TensorCores per chip: keep >=2 blocks on the parallel j axis
    # when the problem would otherwise collapse to a single (i, j) block.
    if N_p // tn == 1 and tn >= 256 and (tn // 2) % 128 == 0:
        tn //= 2

    wt = w.T                                                  # (in, out)
    if wt.shape != (K_p, N_p):
        wt = jnp.pad(wt, ((0, K_p - in_f), (0, N_p - out_f)))

    # Fold scale into U^T once at prep time (no per-tile VPU scaling).
    ut = (u.astype(jnp.float32) * scale).astype(w.dtype).T    # (r, out)
    if ut.shape[1] != N_p:
        ut = jnp.pad(ut, ((0, 0), (0, N_p - out_f)))

    b2 = b.reshape(1, out_f)
    if N_p != out_f:
        b2 = jnp.pad(b2, ((0, 0), (0, N_p - out_f)))

    return dict(wt=wt, ut=ut, b2=b2, a=a,
                in_f=in_f, out_f=out_f, rank=r,
                tn=tn, tk=tk, K_p=K_p, N_p=N_p)


def lora_linear_apply(x, p, *, tm=512):
    """Per-call fused LoRA-Linear forward.  x: (M, in) -> (M, out)."""
    M, in_f = x.shape
    assert in_f == p["in_f"]
    out_f, r = p["out_f"], p["rank"]
    tn, tk, K_p, N_p = p["tn"], p["tk"], p["K_p"], p["N_p"]

    tm = min(tm, _round_up(M, 16))
    M_p = _round_up(M, tm)

    # Tiny LoRA-down projection (M x K x r) done once per call in plain XLA.
    # Kept in f32 so the up-projection LHS is never down-cast.
    d = jnp.dot(x, p["a"].T, preferred_element_type=jnp.float32)   # (M, r)

    x_p = x
    if x.shape != (M_p, K_p):
        x_p = jnp.pad(x, ((0, M_p - M), (0, K_p - in_f)))
    if d.shape != (M_p, r):
        d = jnp.pad(d, ((0, M_p - M), (0, 0)))

    grid = (M_p // tm, N_p // tn, K_p // tk)

    out_dtype = x.dtype
    use_acc = jnp.dtype(out_dtype) != jnp.dtype(jnp.float32)
    kernel = _lora_kernel_acc if use_acc else _lora_kernel_f32out
    scratch = [pltpu.VMEM((tm, tn), jnp.float32)] if use_acc else []

    in_specs = [
        pl.BlockSpec((tm, tk), lambda i, j, k: (i, k)),   # x tile
        pl.BlockSpec((tk, tn), lambda i, j, k: (k, j)),   # W^T tile
        pl.BlockSpec((1, tn), lambda i, j, k: (0, j)),    # bias tile
        pl.BlockSpec((tm, r), lambda i, j, k: (i, 0)),    # d = x @ A^T (f32)
        pl.BlockSpec((r, tn), lambda i, j, k: (0, j)),    # scale * U^T tile
    ]
    out_spec = pl.BlockSpec((tm, tn), lambda i, j, k: (i, j))

    itemsize = x.dtype.itemsize
    out_itemsize = jnp.dtype(out_dtype).itemsize
    tile_bytes = (2 * tm * tk * itemsize                 # x (double-buffered)
                  + 2 * tk * tn * p["wt"].dtype.itemsize  # W^T
                  + 2 * tn * p["b2"].dtype.itemsize       # bias
                  + 2 * tm * r * 4                        # d (f32)
                  + 2 * r * tn * p["ut"].dtype.itemsize   # U^T
                  + 2 * tm * tn * out_itemsize            # out
                  + (tm * tn * 4 if use_acc else 0))      # acc scratch
    vmem_limit = int(min(max(2 * tile_bytes, 32 << 20), 48 << 20))

    flops = 2 * M_p * K_p * N_p + 2 * M_p * r * N_p
    bytes_accessed = int(
        (x_p.size + p["wt"].size + p["b2"].size + p["ut"].size) * itemsize
        + d.size * 4 + M_p * N_p * out_itemsize)

    out_p = pl.pallas_call(
        kernel,
        out_shape=jax.ShapeDtypeStruct((M_p, N_p), out_dtype),
        grid_spec=pltpu.PrefetchScalarGridSpec(
            num_scalar_prefetch=0,
            grid=grid,
            in_specs=in_specs,
            out_specs=out_spec,
            scratch_shapes=scratch,
        ),
        compiler_params=pltpu.CompilerParams(
            dimension_semantics=("parallel", "parallel", "arbitrary"),
            vmem_limit_bytes=vmem_limit,
        ),
        cost_estimate=pl.CostEstimate(
            flops=flops, transcendentals=0, bytes_accessed=bytes_accessed),
    )(x_p, p["wt"], p["b2"], d, p["ut"])

    return out_p[:M, :out_f]


def lora_linear_forward(x, w, b, a, u, *, alpha, rank,
                        tm=512, tn=512, tk=1024):
    """Convenience: prep (normally hoisted/cached) + apply."""
    params = prepare_lora_linear(w, b, a, u, alpha=alpha, rank=rank, tn=tn, tk=tk)
    return lora_linear_apply(x, params, tm=tm)


def lora_linear_reference(x, w, b, a, u, *, alpha, rank):
    scale = float(alpha) / float(rank)
    return x @ w.T + b[None, :] + scale * ((x @ a.T) @ u.T)


if __name__ == "__main__":
    # Small shapes consistent with a Linear orig_module wrapped by LoRAModule.
    batch, seq = 2, 8
    in_features, out_features = 64, 64
    rank = 8
    alpha = 4.0

    M = batch * seq

    key = jax.random.PRNGKey(0)
    kx, kw, kb, ka, ku = jax.random.split(key, 5)

    x = jax.random.normal(kx, (M, in_features), dtype=jnp.float32)
    # orig Linear parameters
    w = jax.random.normal(kw, (out_features, in_features), dtype=jnp.float32) * 0.05
    b = jax.random.normal(kb, (out_features,), dtype=jnp.float32) * 0.01
    # LoRA parameters (lora_down kaiming-like; lora_up nonzero so the path is exercised)
    a = jax.random.normal(ka, (rank, in_features), dtype=jnp.float32) * 0.1
    u = jax.random.normal(ku, (out_features, rank), dtype=jnp.float32) * 0.1
    # TODO(synk): real LoRAModule initializes lora_up.weight to zeros (branch starts disabled).

    # Weight prep is done once (hoisted out of the per-call path), then applied.
    params = prepare_lora_linear(w, b, a, u, alpha=alpha, rank=rank)
    out = lora_linear_apply(x, params)
    out = jax.block_until_ready(out)

    ref = lora_linear_reference(x, w, b, a, u, alpha=alpha, rank=rank)
    assert out.shape == (M, out_features)
    assert jnp.allclose(out, ref, atol=1e-5, rtol=1e-5), "mismatch vs reference"

    print("KERNEL_OK")
</pallas_src>

<mosaic_0001>
module attributes {stable_mosaic.version = 11 : i64} {
  func.func @_lora_kernel_f32out(%arg0: i32, %arg1: i32, %arg2: i32, %arg3: memref<16x128xf32, #tpu.memory_space<vmem>>, %arg4: memref<128x128xf32, #tpu.memory_space<vmem>>, %arg5: memref<1x128xf32, #tpu.memory_space<vmem>>, %arg6: memref<16x8xf32, #tpu.memory_space<vmem>>, %arg7: memref<8x128xf32, #tpu.memory_space<vmem>>, %arg8: memref<16x128xf32, #tpu.memory_space<vmem>>) attributes {dimension_semantics = [#tpu.dimension_semantics<parallel>, #tpu.dimension_semantics<parallel>, #tpu.dimension_semantics<arbitrary>], iteration_bounds = array<i64: 1, 1, 1>, scalar_prefetch = 0 : i64, scratch_operands = 0 : i64, tpu.core_type = #tpu.core_type<tc>, window_params = [{transform_indices = @transform_0, window_bounds = array<i64: 16, 128>}, {transform_indices = @transform_1, window_bounds = array<i64: 128, 128>}, {transform_indices = @transform_2, window_bounds = array<i64: 1, 128>}, {transform_indices = @transform_3, window_bounds = array<i64: 16, 8>}, {transform_indices = @transform_4, window_bounds = array<i64: 8, 128>}, {transform_indices = @transform_5, window_bounds = array<i64: 16, 128>}]} {
    %c0_i32 = arith.constant 0 : i32
    %0 = arith.cmpi eq, %arg2, %c0_i32 : i32
    %1 = arith.extui %0 : i1 to i32
    %c0_i32_0 = arith.constant 0 : i32
    %2 = arith.cmpi ne, %1, %c0_i32_0 : i32
    scf.if %2 {
      %c0_8 = arith.constant 0 : index
      %c0_9 = arith.constant 0 : index
      %9 = vector.load %arg5[%c0_8, %c0_9] : memref<1x128xf32, #tpu.memory_space<vmem>>, vector<1x128xf32>
      %c0_10 = arith.constant 0 : index
      %c0_11 = arith.constant 0 : index
      %10 = vector.load %arg6[%c0_10, %c0_11] : memref<16x8xf32, #tpu.memory_space<vmem>>, vector<16x8xf32>
      %c0_12 = arith.constant 0 : index
      %c0_13 = arith.constant 0 : index
      %11 = vector.load %arg7[%c0_12, %c0_13] : memref<8x128xf32, #tpu.memory_space<vmem>>, vector<8x128xf32>
      %cst_14 = arith.constant dense<0.000000e+00> : vector<16x128xf32>
      %12 = tpu.matmul %10, %11, %cst_14 {dimension_numbers = #tpu.dot_dimension_numbers<[1], [0], [0], [1], [0, 0, 1, 1], [], []>} : vector<16x8xf32>, vector<8x128xf32>, vector<16x128xf32> -> vector<16x128xf32>
      %13 = vector.broadcast %9 : vector<1x128xf32> to vector<16x128xf32>
      %14 = arith.addf %13, %12 : vector<16x128xf32>
      %c0_15 = arith.constant 0 : index
      %c0_16 = arith.constant 0 : index
      %15 = vector.load %arg8[%c0_15, %c0_16] : memref<16x128xf32, #tpu.memory_space<vmem>>, vector<16x128xf32>
      tpu.vector_store %arg8[%c0_15, %c0_16], %14 {strides = array<i32>} : memref<16x128xf32, #tpu.memory_space<vmem>>, vector<16x128xf32>,
    } else {
    }
    %c0 = arith.constant 0 : index
    %c0_1 = arith.constant 0 : index
    %3 = vector.load %arg8[%c0, %c0_1] : memref<16x128xf32, #tpu.memory_space<vmem>>, vector<16x128xf32>
    %c0_2 = arith.constant 0 : index
    %c0_3 = arith.constant 0 : index
    %4 = vector.load %arg3[%c0_2, %c0_3] : memref<16x128xf32, #tpu.memory_space<vmem>>, vector<16x128xf32>
    %c0_4 = arith.constant 0 : index
    %c0_5 = arith.constant 0 : index
    %5 = vector.load %arg4[%c0_4, %c0_5] : memref<128x128xf32, #tpu.memory_space<vmem>>, vector<128x128xf32>
    %cst = arith.constant dense<0.000000e+00> : vector<16x128xf32>
    %6 = tpu.matmul %4, %5, %cst {dimension_numbers = #tpu.dot_dimension_numbers<[1], [0], [0], [1], [0, 0, 1, 1], [], []>} : vector<16x128xf32>, vector<128x128xf32>, vector<16x128xf32> -> vector<16x128xf32>
    %7 = arith.addf %3, %6 : vector<16x128xf32>
    %c0_6 = arith.constant 0 : index
    %c0_7 = arith.constant 0 : index
    %8 = vector.load %arg8[%c0_6, %c0_7] : memref<16x128xf32, #tpu.memory_space<vmem>>, vector<16x128xf32>
    tpu.vector_store %arg8[%c0_6, %c0_7], %7 {strides = array<i32>} : memref<16x128xf32, #tpu.memory_space<vmem>>, vector<16x128xf32>,
    return
  }
  func.func @transform_0(%arg0: i32, %arg1: i32, %arg2: i32) -> (i32, i32) {
    %c0_i32 = arith.constant 0 : i32
    return %arg0, %arg2 : i32, i32
  }
  func.func @transform_1(%arg0: i32, %arg1: i32, %arg2: i32) -> (i32, i32) {
    %c0_i32 = arith.constant 0 : i32
    return %arg2, %arg1 : i32, i32
  }
  func.func @transform_2(%arg0: i32, %arg1: i32, %arg2: i32) -> (i32, i32) {
    %c0_i32 = arith.constant 0 : i32
    %c0_i32_0 = arith.constant 0 : i32
    return %c0_i32, %arg1 : i32, i32
  }
  func.func @transform_3(%arg0: i32, %arg1: i32, %arg2: i32) -> (i32, i32) {
    %c0_i32 = arith.constant 0 : i32
    %c0_i32_0 = arith.constant 0 : i32
    return %arg0, %c0_i32 : i32, i32
  }
  func.func @transform_4(%arg0: i32, %arg1: i32, %arg2: i32) -> (i32, i32) {
    %c0_i32 = arith.constant 0 : i32
    %c0_i32_0 = arith.constant 0 : i32
    return %c0_i32, %arg1 : i32, i32
  }
  func.func @transform_5(%arg0: i32, %arg1: i32, %arg2: i32) -> (i32, i32) {
    %c0_i32 = arith.constant 0 : i32
    return %arg0, %arg1 : i32, i32
  }
}

</mosaic_0001>

<bundles_post_ra>
// kernel: tpu_custom_call.1
= control target key start
LH: loop header
LB: loop body
LE: loop exit
PB: predicated region body
PF: predicated region fallthrough
CT: control target
= control target key end

     0   :  { %10 = vsyncpa [#allocation3], 0  ;;  %s489_s0 = inlined_call_operand.vmem [shape: f32[16,128], index: 0, kind: input, shape index: {}]   ;;  %s490_s1 = inlined_call_operand.hbm [shape: f32[128,128], index: 1, kind: input, shape index: {}]   ;;  %s491_s2 = inlined_call_operand.vmem [shape: f32[1,128], index: 2, kind: input, shape index: {}]   ;;  %s492_s3 = inlined_call_operand.vmem [shape: f32[16,8], index: 3, kind: input, shape index: {}]   ;;  %s493_s4 = inlined_call_operand.vmem [shape: f32[8,128], index: 4, kind: input, shape index: {}]   ;;  %s494_s5 = inlined_call_operand.hbm [shape: f32[16,128], index: 5, kind: output, shape index: {}]  }
   0x1   :  { %11 = vsyncpa [#allocation4], 0  ;;  %s407_s18 = smov [#allocation2]   ;;  %s359_s22 = scalar_lea.hbm %s490_s1, 2048 }
   0x2   :  { %s19_s19 = sshll.u32 %s407_s18, 4  ;;  %p360_p0 = scmp.ne.s32.totalorder %s490_s1, %s359_s22  ;;  %s20_s19 = int_to_ptr.vmem [resolvable:$true] %s19_s19 }
   0x3   :  { %p363_p1 = scmp.lt.u32.totalorder %s359_s22, %s490_s1 }
   0x5   :  { %p365_p2 = pnand %p363_p1, %p360_p0 }
   0x7   :  { %368 = shalt.err (!%p365_p2)
}
   0x8   :  { %s369_s27 = scalar_lea.vmem %s20_s19, 2048  ;;  %p374_p4 = scmp.lt.s32.totalorder %s20_s19, %s20_s19 }
   0x9   :  { %p370_p3 = scmp.ne.s32.totalorder %s20_s19, %s369_s27  ;;  %p375_p5 = scmp.lt.s32.totalorder %s369_s27, %s369_s27 }
   0xb   :  { %p376_p6 = por %p375_p5, %p374_p4 }
   0xd   :  { %p377_p7 = pnand %p376_p6, %p370_p3 }
   0xf   :  { %380 = shalt.err (!%p377_p7)
}
  0x10   :  { %s408_s28 = smov 128   ;;  %s409_s29 = smov 8  }
  0x11   :  { %25 = dma.hbm_to_vmem [thread:$0]  %s490_s1, 2048, %s20_s19, [#allocation3], %s408_s28, %s408_s28, %s409_s29  }
  0x12   :  { %403 = dma.done.wait [#allocation3], 2048  }
  0x13   :  { %404 = vsyncadd [#allocation3], 4294965248  ;;  %v139_v0 = vld [vmem:[#allocation2] sm:$0xff]  ;;  %v140_v1 = vld [vmem:[#allocation2 + $0x8] sm:$0xff]  ;;  %vm43_vm0 = vcmask 64512   ;;  %s410_s16 = smov [#allocation5]  }
  0x14   :  { %v141_v2 = vld [vmem:[#allocation2 + $0x10] sm:$0xff]  ;;  %v315_v3 = vpack.c.bf16 %v140_v1, %v139_v0  ;;  %v142_v4 = vld [vmem:[#allocation2 + $0x18] sm:$0xff]  ;;  %v143_v6 = vld [vmem:[#allocation2 + $0x20] sm:$0xff]  ;;  %s239_s17 = sshll.u32 %s410_s16, 4  ;;  %s240_s17 = int_to_ptr.vmem [resolvable:$true] %s239_s17 }
  0x15   :  { %v319_v5 = vpack.c.bf16 %v142_v4, %v141_v2  ;;  %v144_v7 = vld [vmem:[#allocation2 + $0x28] sm:$0xff]  ;;  %v42_v8 = vld [vmem:[%s493_s4] sm:$0xff]  ;;  %v145_v12 = vld [vmem:[#allocation2 + $0x30] sm:$0xff]  ;;  %s381_s18 = scalar_lea.vmem %s240_s17, 256  ;;  %p386_p9 = scmp.lt.s32.totalorder %s240_s17, %s240_s17 }
  0x16   :  { %316 = vmatprep.subr.bf16.mxu0 %v315_v3  ;;  %v40_v9 = vld [vmem:[%s492_s3] sm:$0xff]  ;;  %275 = vmatprep.subr.mxu1 %v42_v8  ;;  %v41_v10 = vld [vmem:[%s492_s3 + $0x8] sm:$0xff]  ;;  %v323_v11 = vpack.c.bf16 %v144_v7, %v143_v6  ;;  %v146_v13 = vld [vmem:[#allocation2 + $0x38] sm:$0xff]  ;;  %p382_p8 = scmp.ne.s32.totalorder %s240_s17, %s381_s18  ;;  %p387_p10 = scmp.lt.s32.totalorder %s381_s18, %s381_s18 }
  0x17   :  { %318 = vmatpush3.bf16.msra.mxu0 %v315_v3  ;;  %276 = vmatpush3.msra.mxu1 %v42_v8  ;;  %v137_v14 = vld [vmem:[%s489_s0] sm:$0xff]  ;;  %v327_v15 = vpack.c.bf16 %v146_v13, %v145_v12  ;;  %v148_v17 = vld [vmem:[#allocation2 + $0x48] sm:$0xff]  ;;  %v149_v19 = vld [vmem:[#allocation2 + $0x50] sm:$0xff] }
  0x18   :  { %320 = vmatprep.subr.bf16.mxu0 %v319_v5  ;;  %277 = vmatprep.mubr.msk.f32.mxu1 %vm43_vm0, %v40_v9  ;;  %v147_v16 = vld [vmem:[#allocation2 + $0x40] sm:$0xff]  ;;  %v150_v20 = vld [vmem:[#allocation2 + $0x58] sm:$0xff]  ;;  %v152_v23 = vld [vmem:[#allocation2 + $0x68] sm:$0xff]  ;;  %p388_p11 = por %p387_p10, %p386_p9 }
  0x19   :  { %278 = vmatmul.mubr.msk.f32.vlgmr.msra.gmra.mrb[0].mxu1 %vm43_vm0, %v41_v10  ;;  %312 = vmatprep.mubr.f32.mxu0 %v137_v14  ;;  %v331_v18 = vpack.c.bf16 %v148_v17, %v147_v16  ;;  %v335_v21 = vpack.c.bf16 %v150_v20, %v149_v19  ;;  %v151_v22 = vld [vmem:[#allocation2 + $0x60] sm:$0xff]  ;;  %v153_v25 = vld [vmem:[#allocation2 + $0x70] sm:$0xff]  ;;  %v154_v26 = vld [vmem:[#allocation2 + $0x78] sm:$0xff] }
  0x1a   :  { %v339_v24 = vpack.c.bf16 %v152_v23, %v151_v22  ;;  %v343_v27 = vpack.c.bf16 %v154_v26, %v153_v25  ;;  %v138_v28 = vld [vmem:[%s489_s0 + $0x8] sm:$0xff]  ;;  %v253_v31 = vld [vmem:[%s491_s2] ss:$0 sm:$0xff]  ;;  %p389_p12 = pnand %p388_p11, %p382_p8 }
  0x1b   :  { %322 = vmatpush3.bf16.msra.mxu0 %v319_v5 }
  0x1c   :  { %324 = vmatprep.subr.bf16.mxu0 %v323_v11 }
  0x1f   :  { %326 = vmatpush3.bf16.msra.mxu0 %v323_v11 }
  0x20   :  { %328 = vmatprep.subr.bf16.mxu0 %v327_v15 }
  0x23   :  { %330 = vmatpush3.bf16.msra.mxu0 %v327_v15 }
  0x24   :  { %332 = vmatprep.subr.bf16.mxu0 %v331_v18 }
  0x27   :  { %334 = vmatpush3.bf16.msra.mxu0 %v331_v18 }
  0x28   :  { %336 = vmatprep.subr.bf16.mxu0 %v335_v21 }
  0x2b   :  { %338 = vmatpush3.bf16.msra.mxu0 %v335_v21 }
  0x2c   :  { %340 = vmatprep.subr.bf16.mxu0 %v339_v24 }
  0x2f   :  { %342 = vmatpush3.bf16.msra.mxu0 %v339_v24 }
  0x30   :  { %344 = vmatprep.subr.bf16.mxu0 %v343_v27 }
  0x33   :  { %346 = vmatpush3.bf16.msra.mxu0 %v343_v27 }
  0x36   :  { %313 = vmatmul.mubr.f32.vlgmr.msra.gmra.mrb[0].mxu0 %v138_v28 }
  0xec   :  { %v279_v29 = vpop.f32.mrb[0].mxu1 }
  0xed   :  { %v116_v30 = vpop.f32.mrb[1].mxu1  ;;  %v132_v32 = vadd.f32 %v279_v29, %v253_v31 }
  0xee   :  { %v131_v33 = vadd.f32 %v253_v31, %v116_v30 }
 0x109   :  { %v314_v34 = vpop.f32.mrb[0].mxu0 }
 0x10a   :  { %v350_v35 = vadd.f32 %v314_v34, %v132_v32  ;;  %v221_v36 = vpop.f32.mrb[1].mxu0 }
 0x10b   :  { %v354_v37 = vadd.f32 %v221_v36, %v131_v33 }
 0x10c   :  { %233 = vst [vmem:[#allocation5 + $0x8] sm:$0xff] %v350_v35 }
 0x10d   :  { %232 = vst [vmem:[#allocation5] sm:$0xff] %v354_v37 }
 0x10e   :  { %392 = shalt.err (!%p389_p12)
}
 0x10f   :  { %s393_s19 = scalar_lea.hbm %s494_s5, 256 }
 0x110   :  { %p394_p13 = scmp.ne.s32.totalorder %s494_s5, %s393_s19  ;;  %p397_p0 = scmp.lt.u32.totalorder %s393_s19, %s494_s5 }
 0x112   :  { %p399_p1 = pnand %p397_p0, %p394_p13 }
 0x114   :  { %402 = shalt.err (!%p399_p1)
}
 0x115   :  { %245 = dma.vmem_to_hbm [thread:$0]  %s240_s17, 256, %s494_s5, [#allocation4], %s408_s28, %s408_s28, %s409_s29  }
 0x116   :  { %405 = dma.done.wait [#allocation4], 256  }
 0x117   :  { %406 = vsyncadd [#allocation4], 4294967040 }
 0x118   :  { %249 = vsyncpa [#allocation3], 1 }
 0x119   :  { %250 = vsyncpa [#allocation4], 1 }

</bundles_post_ra>
